<compile_context>
chip_gen: v5e
topology: v5e:2x2
jax: 0.10.0
libtpu: 0.0.40
codegen_flags: <defaults>
</compile_context>

<pallas_src>
import jax
import jax.numpy as jnp
from jax.experimental import pallas as pl
from jax.experimental.pallas import tpu as pltpu


def conv_relu_kernel(p_ref, w_ref, b_ref, o_ref):
    # p_ref: (Kp, TM)    im2col patch block (K on sublanes, spatial on lanes)
    # w_ref: (Cout, Kp)  fused conv weights (block index constant -> resident)
    # b_ref: (Cout, 1)   bias
    # o_ref: (Cout, TM)  lane-dense output block (TM % 128 == 0)
    acc = jnp.dot(w_ref[...], p_ref[...], preferred_element_type=jnp.float32)
    acc = acc + b_ref[...]                                   # lane-broadcast bias
    o_ref[...] = jnp.maximum(acc, 0.0).astype(o_ref.dtype)   # ReLU


def _pick_tile(m, k_pad, c_out, *, budget_bytes=8 << 20):
    """Largest lane-aligned column tile that stays in a small VMEM budget
    (double-buffered input + output blocks, resident weights) while leaving
    >= 2 grid steps whenever the problem allows it."""
    for tm in (2048, 1024, 512, 256, 128):
        bytes_needed = 2 * (k_pad * tm + c_out * tm + c_out * k_pad) * 4
        if bytes_needed <= budget_bytes and pl.cdiv(m, tm) >= 2:
            return tm
    return 128


def conv_relu_pallas(x_nchw, weight, bias, *, tm=None):
    """ConvRelu forward (matches nn.Conv2d(k=3, s=1, p=1) + ReLU).

    x_nchw: (N, Cin, H, W) float32
    weight: (Cout, Cin, 3, 3) float32 (PyTorch OIHW layout)
    bias:   (Cout,) float32
    returns (N, Cout, H, W) float32
    """
    N, Cin, H, W = x_nchw.shape
    Cout = weight.shape[0]
    K = 9 * Cin
    Kp = pl.cdiv(K, 8) * 8          # sublane-align the contraction dim
    M = N * H * W

    # ---- wrapper-side layout plumbing (XLA glue) ----------------------------
    # im2col, channels-first: rows = (kh, kw, ci), cols = (n, h, w).
    x_pad = jnp.pad(x_nchw, ((0, 0), (0, 0), (1, 1), (1, 1)))           # (N,Cin,H+2,W+2)
    taps = [x_pad[:, :, kh:kh + H, kw:kw + W]
            for kh in range(3) for kw in range(3)]                       # 9 x (N,Cin,H,W)
    patches = jnp.stack(taps, axis=0)                                    # (9,N,Cin,H,W)
    patches = patches.transpose(0, 2, 1, 3, 4).reshape(K, M)             # (9*Cin, N*H*W)

    if tm is None:
        tm = _pick_tile(M, Kp, Cout)
    assert tm % 128 == 0, "column tile must be lane-aligned"

    # Pad contraction rows to a sublane multiple and the folded spatial axis
    # to a multiple of the lane tile (zero padding -> math unchanged).
    m_pad = pl.cdiv(M, tm) * tm
    patches = jnp.pad(patches, ((0, Kp - K), (0, m_pad - M)))

    # Weight (Cout, Cin, 3, 3) -> (Cout, kh, kw, Cin) -> (Cout, 9*Cin),
    # column order matching the patch-row order (kh, kw, ci); pad K to Kp.
    w2 = weight.transpose(0, 2, 3, 1).reshape(Cout, K)
    w2 = jnp.pad(w2, ((0, 0), (0, Kp - K)))
    b2 = bias.reshape(Cout, 1)

    grid = (m_pad // tm,)
    out = pl.pallas_call(
        conv_relu_kernel,
        out_shape=jax.ShapeDtypeStruct((Cout, m_pad), x_nchw.dtype),
        grid=grid,
        in_specs=[
            pl.BlockSpec((Kp, tm), lambda m: (0, m)),      # patch column block
            pl.BlockSpec((Cout, Kp), lambda m: (0, 0)),    # weights (resident)
            pl.BlockSpec((Cout, 1), lambda m: (0, 0)),     # bias (resident)
        ],
        out_specs=pl.BlockSpec((Cout, tm), lambda m: (0, m)),
        compiler_params=pltpu.CompilerParams(
            # Independent output blocks -> megacore / dual-TC friendly.
            dimension_semantics=("parallel",),
        ),
    )(patches, w2, b2)

    # (Cout, N*H*W) -> (N, Cout, H, W) to match the PyTorch NCHW contract.
    out = out[:, :M].reshape(Cout, N, H, W).transpose(1, 0, 2, 3)
    return out


def _reference(x_nchw, weight, bias):
    # Pure-JAX reference using lax conv (NCHW, OIHW).
    out = jax.lax.conv_general_dilated(
        x_nchw, weight,
        window_strides=(1, 1),
        padding=((1, 1), (1, 1)),
        dimension_numbers=("NCHW", "OIHW", "NCHW"),
    )
    out = out + bias.reshape(1, -1, 1, 1)
    return jnp.maximum(out, 0.0)


if __name__ == "__main__":
    key = jax.random.PRNGKey(0)
    k_x, k_w, k_b = jax.random.split(key, 3)

    N, Cin, Cout, H, W = 2, 4, 8, 16, 16

    x = jax.random.normal(k_x, (N, Cin, H, W), dtype=jnp.float32)
    # Deterministic parameter init (kaiming-uniform-like bound, synthetic).
    fan_in = Cin * 3 * 3
    bound = 1.0 / (fan_in ** 0.5)
    weight = jax.random.uniform(k_w, (Cout, Cin, 3, 3), jnp.float32, -bound, bound)
    bias = jax.random.uniform(k_b, (Cout,), jnp.float32, -bound, bound)

    out = conv_relu_pallas(x, weight, bias)
    out = jax.block_until_ready(out)

    ref = _reference(x, weight, bias)
    assert out.shape == (N, Cout, H, W)
    assert jnp.allclose(out, ref, atol=1e-4, rtol=1e-4), "mismatch vs reference"

    print("KERNEL_OK")
</pallas_src>

<mosaic_0001>
module attributes {stable_mosaic.version = 11 : i64} {
  func.func @conv_relu_kernel(%arg0: i32, %arg1: memref<40x256xf32, #tpu.memory_space<vmem>>, %arg2: memref<8x40xf32, #tpu.memory_space<vmem>>, %arg3: memref<8x1xf32, #tpu.memory_space<vmem>>, %arg4: memref<8x256xf32, #tpu.memory_space<vmem>>) attributes {dimension_semantics = [#tpu.dimension_semantics<parallel>], iteration_bounds = array<i64: 2>, scalar_prefetch = 0 : i64, scratch_operands = 0 : i64, tpu.core_type = #tpu.core_type<tc>, window_params = [{transform_indices = @transform_0, window_bounds = array<i64: 40, 256>}, {pipeline_mode = #tpu.pipeline_mode<synchronous>, transform_indices = @transform_1, window_bounds = array<i64: 8, 40>}, {pipeline_mode = #tpu.pipeline_mode<synchronous>, transform_indices = @transform_2, window_bounds = array<i64: 8, 1>}, {transform_indices = @transform_3, window_bounds = array<i64: 8, 256>}]} {
    %c0 = arith.constant 0 : index
    %c0_0 = arith.constant 0 : index
    %0 = vector.load %arg2[%c0, %c0_0] : memref<8x40xf32, #tpu.memory_space<vmem>>, vector<8x40xf32>
    %c0_1 = arith.constant 0 : index
    %c0_2 = arith.constant 0 : index
    %1 = vector.load %arg1[%c0_1, %c0_2] : memref<40x256xf32, #tpu.memory_space<vmem>>, vector<40x256xf32>
    %cst = arith.constant dense<0.000000e+00> : vector<8x256xf32>
    %2 = tpu.matmul %0, %1, %cst {dimension_numbers = #tpu.dot_dimension_numbers<[1], [0], [0], [1], [0, 0, 1, 1], [], []>} : vector<8x40xf32>, vector<40x256xf32>, vector<8x256xf32> -> vector<8x256xf32>
    %c0_3 = arith.constant 0 : index
    %c0_4 = arith.constant 0 : index
    %3 = vector.load %arg3[%c0_3, %c0_4] : memref<8x1xf32, #tpu.memory_space<vmem>>, vector<8x1xf32>
    %4 = vector.broadcast %3 : vector<8x1xf32> to vector<8x256xf32>
    %5 = arith.addf %2, %4 : vector<8x256xf32>
    %cst_5 = arith.constant 0.000000e+00 : f32
    %6 = vector.broadcast %cst_5 : f32 to vector<8x256xf32>
    %7 = arith.maximumf %5, %6 : vector<8x256xf32>
    %c0_6 = arith.constant 0 : index
    %c0_7 = arith.constant 0 : index
    %8 = vector.load %arg4[%c0_6, %c0_7] : memref<8x256xf32, #tpu.memory_space<vmem>>, vector<8x256xf32>
    tpu.vector_store %arg4[%c0_6, %c0_7], %7 {strides = array<i32>} : memref<8x256xf32, #tpu.memory_space<vmem>>, vector<8x256xf32>,
    return
  }
  func.func @transform_0(%arg0: i32) -> (i32, i32) {
    %c0_i32 = arith.constant 0 : i32
    %c0_i32_0 = arith.constant 0 : i32
    return %c0_i32, %arg0 : i32, i32
  }
  func.func @transform_1(%arg0: i32) -> (i32, i32) {
    %c0_i32 = arith.constant 0 : i32
    %c0_i32_0 = arith.constant 0 : i32
    %c0_i32_1 = arith.constant 0 : i32
    return %c0_i32, %c0_i32_0 : i32, i32
  }
  func.func @transform_2(%arg0: i32) -> (i32, i32) {
    %c0_i32 = arith.constant 0 : i32
    %c0_i32_0 = arith.constant 0 : i32
    %c0_i32_1 = arith.constant 0 : i32
    return %c0_i32, %c0_i32_0 : i32, i32
  }
  func.func @transform_3(%arg0: i32) -> (i32, i32) {
    %c0_i32 = arith.constant 0 : i32
    %c0_i32_0 = arith.constant 0 : i32
    return %c0_i32, %arg0 : i32, i32
  }
}

</mosaic_0001>

<bundles_post_ra>
// kernel: tpu_custom_call.1
= control target key start
LH: loop header
LB: loop body
LE: loop exit
PB: predicated region body
PF: predicated region fallthrough
CT: control target
= control target key end

     0   :  { %8 = vsyncpa [#allocation3], 0  ;;  %s662_s0 = inlined_call_operand.hbm [shape: f32[40,512], index: 0, kind: input, shape index: {}]   ;;  %s663_s1 = inlined_call_operand.vmem [shape: f32[8,40], index: 1, kind: input, shape index: {}]   ;;  %s664_s2 = inlined_call_operand.vmem [shape: f32[8,1], index: 2, kind: input, shape index: {}]   ;;  %s665_s3 = inlined_call_operand.hbm [shape: f32[8,512], index: 3, kind: output, shape index: {}]  }
   0x1   :  { %10 = vsyncpa [#allocation3 + $0x1], 0 }
   0x2   :  { %11 = vsyncpa [#allocation4], 0 }
   0x3   :  { %13 = vsyncpa [#allocation4 + $0x1], 0  ;;  %s536_s12 = smov 0   ;;  %s538_s13 = smov 0  }
   0x4   :  { %s540_s14 = smov 0   ;;  %s542_s15 = smov 0  }
   0x5 LB: > { %s557_s16 = sadd.s32 4294967295, %s510_s15   ;;  %s345_s17 = sadd.s32 4294967294, %s510_s15   ;;  %s510_s15 = sphi %s542_s15, %s673_s15   ;;  %s506_s14 = sphi %s540_s14, %s672_s14   ;;  %s502_s13 = sphi %s538_s13, %s671_s13   ;;  %s498_s12 = sphi %s536_s12, %s670_s12  }
   0x6   : > { %s561_s18 = sadd.s32 1, %s510_s15   ;;  %s26_s19 = sadd.s32 1, %s506_s14 }
   0x7   : > { %s23_s20 = ssub.s32 %s510_s15, %s561_s18  ;;  %p33_p0 = scmp.ne.s32.totalorder %s506_s14, %s502_s13 }
   0x8   : > { %p24_p1 = scmp.eq.s32.totalorder %s23_s20, 0  ;;  %p34_p2 = scmp.eq.s32.totalorder %s510_s15, 0 }
   0x9   : > { %p39_p3 = scmp.ne.s32.totalorder %s502_s13, %s498_s12  ;;  %p40_p4 = scmp.eq.s32.totalorder %s557_s16, 0 }
   0xa   : > { %s573_s21 = scalar_select %p24_p1, %s506_s14, %s26_s19  }
   0xb   : > { %p35_p5 = por %p34_p2, %p33_p0  ;;  %p575_p6 = por %p40_p4, %p39_p3 }
   0xc   : > { %p105_p7 = scmp.eq.s32.totalorder %s557_s16, 1  ;;  %p111_p8 = scmp.eq.s32.totalorder %s345_s17, 1 }
   0xd   : > { %p347_p9 = scmp.ge.s32.totalorder %s510_s15, 2  ;;  %p375_p10 = scmp.lt.s32.totalorder %s510_s15, 2 }
   0xe   : > { %p582_p11 = por %p105_p7, %p33_p0  ;;  %p586_p12 = por %p111_p8, %p39_p3 }
   0xf   : > { %s137_s25 = sand.u32 1, %s506_s14   ;;  %s359_s26 = sshll.u32 %s510_s15, 4 }
  0x10   : > { %s361_s27 = smul.u32 80, %s137_s25  ;;  %s146_s30 = scalar_lea.hbm %s662_s0, %s359_s26 }
  0x11   : > { %p595_p13 = pnand %p375_p10, %p35_p5  ;;  %s147_s5 = sshll.u32 %s146_s30, 4  ;;  %s148_s5 = int_to_ptr.hbm [resolvable:$true] %s147_s5 }
  0x12   : > { %s141_s6 = scalar_lea.vmem [#allocation2], %s361_s27  ;;  %p350_p0 = scmp.ge.s32.totalorder %s510_s15, 1 }
  0x13   : > { %s149_s7 = sshll.u32 %s141_s6, 4  ;;  %s138_s8 = scalar_lea.sflag [#allocation3], %s137_s25  ;;  %s150_s7 = int_to_ptr.vmem [resolvable:$true] %s149_s7 }
  0x14   : > { %s414_s9 = sshra.s32 %s148_s5, 4  ;;  %p418_p2 = pneg %p595_p13  ;;  %s415_s9 = int_to_ptr.hbm [resolvable:$true] %s414_s9 }
  0x15   : > { %s416_s10 = scalar_lea.hbm %s415_s9, 80  ;;  %s421_s19 = scalar_lea.hbm %s662_s0, 160 }
  0x16   : > { %p417_p1 = scmp.ne.s32.totalorder %s415_s9, %s416_s10  ;;  %p422_p5 = scmp.lt.s32.totalorder %s415_s9, %s662_s0 }
  0x17   : > { %p423_p7 = scmp.lt.s32.totalorder %s421_s19, %s416_s10 }
  0x18   : > { %p419_p3 = pnand %p418_p2, %p417_p1 }
  0x19   : > { %p424_p8 = por %p423_p7, %p422_p5 }
  0x1a   : > { %p420_p4 = pneg %p419_p3 }
  0x1c   : > { %p425_p10 = pnand %p424_p8, %p420_p4 }
  0x1e   : > { %428 = shalt.err (!%p425_p10)
}
  0x1f   : > { %s512_s25 = smov 512   ;;  %s513_s27 = smov 256  }
  0x20   : > { %s514_s28 = smov 16   ;;  %p157_p1 = scmp.lt.s32.totalorder %s510_s15, 3 }
  0x21   : > { %370 = dma.hbm_to_vmem [thread:$0]  (!%p595_p13), %s148_s5, 1280, %s150_s7, %s138_s8, %s512_s25, %s513_s27, %s514_s28  }
  0x22   : > { %p158_p2 = pnand %p350_p0, %p157_p1 }
  0x23   : > { %s614_s29 = sand.u32 (!%p158_p2), 1, %s502_s13  }
  0x24   : > { %161 = sbr.rel (%p158_p2) target bundleno = 186 (0xba), region = 32  ;;  %s164_s6 = scalar_lea.sflag (!%p158_p2), [#allocation3], %s614_s29 }
  0x25   : > { %s362_s30 = smul.u32 (!%p158_p2), 80, %s614_s29 }
  0x27   : > { %s167_s9 = scalar_lea.vmem (!%p158_p2), [#allocation2], %s362_s30 }
  0x29   : > { %489 = dma.done.wait (%p575_p6), %s164_s6, 1280  }
  0x2a   : > { %491 = vsyncadd (%p575_p6), %s164_s6, 4294966016  ;;  %v515_v0 = vmov 0   ;;  %v202_v1 = vld [vmem:[%s167_s9 + $0x40] sm:$0xff]  ;;  %v203_v2 = vld [vmem:[%s167_s9 + $0x48] sm:$0xff]  ;;  %vm210_vm0 = vcmask 326656   ;;  %s351_s8 = sshll.u32 %s614_s29, 4 }
  0x2b   : > { %413 = vset.pattern.permute.xlu0 %v515_v0  ;;  %v200_v3 = vld [vmem:[%s167_s9 + $0x30] sm:$0xff]  ;;  %225 = vmatpush.msra.mxu0 %v202_v1  ;;  %v201_v4 = vld [vmem:[%s167_s9 + $0x38] sm:$0xff]  ;;  %v198_v5 = vld [vmem:[%s167_s9 + $0x20] sm:$0xff]  ;;  %s360_s10 = sshll.u32 %s557_s16, 4  ;;  %s190_s20 = scalar_lea.vmem [#allocation5], %s351_s8 }
  0x2c   : > { %245 = vmatpush.msra.mxu1 %v203_v2  ;;  %v199_v6 = vld [vmem:[%s167_s9 + $0x28] sm:$0xff]  ;;  %v204_v7 = vld [vmem:[%s664_s2] sm:$0xff]  ;;  %v197_v9 = vld [vmem:[%s167_s9 + $0x18] sm:$0xff]  ;;  %s270_s19 = scalar_lea.hbm %s665_s3, %s360_s10  ;;  %s272_s26 = sshll.u32 %s190_s20, 4  ;;  %s273_s26 = int_to_ptr.vmem [resolvable:$true] %s272_s26 }
  0x2d   : > { %226 = vmatpush.msra.mxu0 %v200_v3  ;;  %v196_v8 = vld [vmem:[%s167_s9 + $0x10] sm:$0xff]  ;;  %207 = vperm.xlu0 %413, %v204_v7   ;;  %v194_v10 = vld [vmem:[%s167_s9] sm:$0xff]  ;;  %v195_v11 = vld [vmem:[%s167_s9 + $0x8] sm:$0xff]  ;;  %s274_s25 = sshll.u32 %s270_s19, 4  ;;  %s259_s16 = scalar_lea.sflag [#allocation4], %s614_s29  ;;  %s275_s25 = int_to_ptr.hbm [resolvable:$true] %s274_s25 }
  0x2e   : > { %246 = vmatpush.msra.mxu1 %v201_v4  ;;  %v193_v12 = vld [vmem:[%s663_s1] sm:$0xff]  ;;  %s458_s27 = sshra.s32 %s275_s25, 4  ;;  %s464_s9 = scalar_lea.hbm %s665_s3, 32  ;;  %s459_s27 = int_to_ptr.hbm [resolvable:$true] %s458_s27 }
  0x2f   : > { %227 = vmatpush.msra.mxu0 %v198_v5  ;;  %s460_s28 = scalar_lea.hbm %s459_s27, 16  ;;  %p465_p3 = scmp.lt.s32.totalorder %s459_s27, %s665_s3 }
  0x30   : > { %247 = vmatpush.msra.mxu1 %v199_v6  ;;  %p461_p6 = scmp.ne.s32.totalorder %s459_s27, %s460_s28  ;;  %p466_p4 = scmp.lt.s32.totalorder %s464_s9, %s460_s28 }
  0x31   : > { %228 = vmatpush.msra.mxu0 %v196_v8 }
  0x32   : > { %248 = vmatpush.msra.mxu1 %v197_v9  ;;  %p462_p13 = pnand %p461_p6, %p582_p11  ;;  %p467_p5 = por %p466_p4, %p465_p3 }
  0x33   : > { %229 = vmatpush.msra.mxu0 %v194_v10 }
  0x34   : > { %249 = vmatpush.msra.mxu1 %v195_v11  ;;  %352 = vmatmul.msk.f32.vlgmr.msra.gmra.mxu0 %vm210_vm0, %v193_v12  ;;  %p463_p0 = pneg %p462_p13 }
  0x35   : > { %353 = vmatmul.msk.f32.vlgmr.msra.gmra.mxu1 %vm210_vm0, %v193_v12 }
  0x36   : > { %p468_p7 = pnand %p467_p5, %p463_p0 }
  0x9f   : > { %v208_v13 = vpop.permute.xlu0 %207 }
  0xb1   : > { %v231_v14 = vpop.f32.mrf.mxu0 }
  0xb2   : > { %v251_v15 = vpop.f32.mrf.mxu1  ;;  %v232_v16 = vadd.f32 %v231_v14, %v208_v13 }
  0xb3   : > { %v252_v17 = vadd.f32 %v251_v15, %v208_v13 }
  0xb4   : > { %v254_v18 = vmax.f32 %v232_v16, 0.0 }
  0xb5   : > { %v255_v19 = vmax.f32 %v252_v17, 0.0 }
  0xb6   : > { %256 = vst [vmem:[%s190_s20] sm:$0xff] %v254_v18 }
  0xb7   : > { %257 = vst [vmem:[%s190_s20 + $0x8] sm:$0xff] %v255_v19 }
  0xb8   : > { %471 = shalt.err (!%p468_p7)
}
  0xb9   : > { %365 = dma.vmem_to_hbm [thread:$0]  (%p582_p11), %s273_s26, 256, %s275_s25, %s259_s16  }
  0xba PF: > { %s286_s29 = sand.u32 1, %s498_s12   ;;  %p372_p8 = pnand %p347_p9, %p586_p12 }
  0xbb   : > { %s287_s22 = scalar_lea.sflag [#allocation4], %s286_s29 }
  0xbc   : > { %p373_p10 = pneg %p372_p8 }
  0xbe   : > { %493 = dma.done.wait (%p373_p10), %s287_s22, 256  }
  0xbf   : > { %495 = vsyncadd (%p373_p10), %s287_s22, 4294967040  ;;  %p16_p1 = scmp.ge.s32.totalorder %s561_s18, 4   ;;  %s670_s12 = smov %s502_s13 }
  0xc0   : > { %s671_s13 = smov %s506_s14  ;;  %s672_s14 = smov %s573_s21 }
  0xc1   : > { %s673_s15 = smov %s561_s18  ;;  %18 = sbr.rel (!%p16_p1) target bundleno = 5 (0x5), region = 77 }
  0xc6   :  { %293 = vsyncpa [#allocation3], 1 }
  0xc7   :  { %295 = vsyncpa [#allocation3 + $0x1], 1 }
  0xc8   :  { %296 = vsyncpa [#allocation4], 1 }
  0xc9   :  { %298 = vsyncpa [#allocation4 + $0x1], 1 }

</bundles_post_ra>
